<compile_context>
chip_gen: v6e
topology: v6e:2x2x1
jax: 0.10.0
libtpu: 0.0.40
codegen_flags: <defaults>
</compile_context>

<pallas_src>
import functools

import jax
import jax.numpy as jnp
from jax.experimental import pallas as pl
from jax.experimental.pallas import tpu as pltpu


def _round_up(v, m):
    return ((v + m - 1) // m) * m


def _readout_kernel(x_ref, fw_ref, fb_ref, sum_out, max_out, sum_acc, max_acc,
                    *, n_total, d_in, tile_n, tiles_per_split, num_tiles,
                    mm_dtype):
    p = pl.program_id(0)                      # parallel split (megacore axis)
    j = pl.program_id(1)                      # node tile within this split
    global_tile = p * tiles_per_split + j

    # ---- init per-split accumulators on the first tile of the split --------
    @pl.when(j == 0)
    def _():
        sum_acc[...] = jnp.zeros_like(sum_acc)
        # g = sigmoid(.) * relu(.) >= 0, so 0 is a valid floor for the max.
        # (If the activation/gating ever changes, switch to -inf init + mask.)
        max_acc[...] = jnp.zeros_like(max_acc)

    # ---- fused attention + embedding projection (single MXU pass) ----------
    x = x_ref[...]
    if mm_dtype is not None and x.dtype != mm_dtype:
        x = x.astype(mm_dtype)                # in-kernel cast: no HBM round-trip
    z = jnp.dot(x, fw_ref[...],
                preferred_element_type=jnp.float32) + fb_ref[...]  # (tile_n, d_in+1) f32
    emb = jnp.maximum(z[:, :d_in], 0.0)                            # ReLU branch
    att = jax.nn.sigmoid(z[:, d_in:d_in + 1])                      # (tile_n, 1)
    g = att * emb                                                  # (tile_n, d_in), >= 0

    def _accumulate(g_val):
        sum_acc[...] += jnp.sum(g_val, axis=0, keepdims=True)
        max_acc[...] = jnp.maximum(max_acc[...],
                                   jnp.max(g_val, axis=0, keepdims=True))

    # ---- accumulate; mask rows past N only on the single partial tile ------
    if n_total % tile_n != 0:
        last = num_tiles - 1

        @pl.when(global_tile == last)
        def _():
            row = (global_tile * tile_n
                   + jax.lax.broadcasted_iota(jnp.int32, (tile_n, 1), 0))
            # Mask BEFORE both accumulations: padded rows are unspecified.
            _accumulate(jnp.where(row < n_total, g, 0.0))

        @pl.when(global_tile != last)
        def _():
            _accumulate(g)
    else:
        _accumulate(g)

    # ---- per-split epilogue: emit this split's partial sum / max -----------
    @pl.when(j == tiles_per_split - 1)
    def _():
        sum_out[...] = sum_acc[...].reshape(sum_out.shape)
        max_out[...] = max_acc[...].reshape(max_out.shape)


def readout_layer(x, att_w, att_b, emb_w, emb_b, mlp_w, mlp_b,
                  *, tile_n=None, matmul_dtype=None, use_megacore=True):
    """x: (N, input_dim) float32 -> (output_dim,) float32 (inference mode)."""
    n, d_in = x.shape
    d_out = mlp_w.shape[1]
    x_itemsize = jnp.dtype(x.dtype).itemsize

    # Fuse [emb | att] projections: one (d_in, d_in+1) weight + one bias row.
    # These are tiny, grid-resident operands, so the wrapper-side cast is free.
    fused_w = jnp.concatenate([emb_w, att_w], axis=1)
    fused_w = fused_w.astype(matmul_dtype if matmul_dtype is not None
                             else jnp.float32)
    fused_b = jnp.concatenate([emb_b, att_b]).reshape(1, d_in + 1)
    fused_b = fused_b.astype(jnp.float32)

    # ---- node-tile size: target ~2 MiB x blocks (HBM-roofline territory) ---
    if tile_n is None:
        target_rows = (2 * 1024 * 1024) // max(1, d_in * x_itemsize)
        tile_n = min(max(target_rows, 8), _round_up(n, 8), 65536)
    tile_n = max(8, _round_up(tile_n, 8))
    num_tiles = pl.cdiv(n, tile_n)

    # ---- megacore split: parallel leading axis with per-split partials -----
    # Only split when the tile count divides evenly, so every (p, j) maps to a
    # real tile (no fully out-of-bounds blocks).
    num_splits = 2 if (use_megacore and num_tiles >= 2
                       and num_tiles % 2 == 0) else 1
    tiles_per_split = num_tiles // num_splits

    kernel = functools.partial(
        _readout_kernel, n_total=n, d_in=d_in, tile_n=tile_n,
        tiles_per_split=tiles_per_split, num_tiles=num_tiles,
        mm_dtype=matmul_dtype)

    grid_spec = pltpu.PrefetchScalarGridSpec(
        num_scalar_prefetch=0,
        grid=(num_splits, tiles_per_split),
        in_specs=[
            pl.BlockSpec((tile_n, d_in),
                         lambda p, j: (p * tiles_per_split + j, 0)),   # x (pipelined)
            pl.BlockSpec((d_in, d_in + 1), lambda p, j: (0, 0)),       # fused weight
            pl.BlockSpec((1, d_in + 1), lambda p, j: (0, 0)),          # fused bias
        ],
        out_specs=[
            pl.BlockSpec((1, 1, d_in), lambda p, j: (p, 0, 0)),        # per-split sum
            pl.BlockSpec((1, 1, d_in), lambda p, j: (p, 0, 0)),        # per-split max
        ],
        scratch_shapes=[
            pltpu.VMEM((1, d_in), jnp.float32),                        # running sum
            pltpu.VMEM((1, d_in), jnp.float32),                        # running max
        ],
    )

    x_tile_bytes = tile_n * d_in * x_itemsize
    vmem_limit = int(min(64 * 1024 * 1024,
                         max(16 * 1024 * 1024, 2 * x_tile_bytes + (4 << 20))))

    cost = pl.CostEstimate(
        flops=2 * n * d_in * (d_in + 1),
        transcendentals=n,                           # one sigmoid per node
        bytes_accessed=(n * d_in * x_itemsize
                        + fused_w.size * jnp.dtype(fused_w.dtype).itemsize
                        + fused_b.size * 4
                        + 2 * num_splits * d_in * 4))

    sum_p, max_p = pl.pallas_call(
        kernel,
        out_shape=(jax.ShapeDtypeStruct((num_splits, 1, d_in), jnp.float32),
                   jax.ShapeDtypeStruct((num_splits, 1, d_in), jnp.float32)),
        grid_spec=grid_spec,
        compiler_params=pltpu.CompilerParams(
            # Node-tile axis is a reduction into the scratch accumulators;
            # the split axis is independent (per-core on v7x).
            dimension_semantics=("parallel", "arbitrary"),
            vmem_limit_bytes=vmem_limit,
        ),
        cost_estimate=cost,
    )(x, fused_w, fused_b)

    # ---- tiny cross-split combine + final MLP (negligible, done in XLA) ----
    g_pool = jnp.sum(sum_p[:, 0, :], axis=0) / n + jnp.max(max_p[:, 0, :], axis=0)
    return g_pool @ mlp_w.astype(jnp.float32) + mlp_b.astype(jnp.float32)


def _glorot(key, shape):
    fan_in, fan_out = shape[0], shape[1]
    limit = jnp.sqrt(6.0 / (fan_in + fan_out))
    return jax.random.uniform(key, shape, jnp.float32, -limit, limit)


def _reference(x, att_w, att_b, emb_w, emb_b, mlp_w, mlp_b, matmul_dtype=None):
    # Pure-JAX reference.  With matmul_dtype set, the matmul operands are
    # quantized the same way the kernel does (narrow operands, f32 accumulate).
    if matmul_dtype is not None:
        x = x.astype(matmul_dtype).astype(jnp.float32)
        att_w = att_w.astype(matmul_dtype).astype(jnp.float32)
        emb_w = emb_w.astype(matmul_dtype).astype(jnp.float32)
    att = jax.nn.sigmoid(x @ att_w + att_b)
    emb = jnp.maximum(x @ emb_w + emb_b, 0.0)
    n = x.shape[0]
    g = att * emb
    g = jnp.sum(g, axis=0) / n + jnp.max(g, axis=0)
    return g @ mlp_w + mlp_b


if __name__ == "__main__":
    input_dim, output_dim = 32, 16
    n_nodes = 20   # deliberately NOT a multiple of 8/tile_n -> exercises masking

    key = jax.random.PRNGKey(0)
    k_x, k_att, k_emb, k_mlp = jax.random.split(key, 4)

    x = jax.random.normal(k_x, (n_nodes, input_dim), jnp.float32)
    att_w = _glorot(k_att, (input_dim, 1))
    emb_w = _glorot(k_emb, (input_dim, input_dim))
    mlp_w = _glorot(k_mlp, (input_dim, output_dim))
    att_b = jnp.zeros((1,), jnp.float32)
    emb_b = jnp.zeros((input_dim,), jnp.float32)
    mlp_b = jnp.zeros((output_dim,), jnp.float32)

    ref_f32 = _reference(x, att_w, att_b, emb_w, emb_b, mlp_w, mlp_b)

    # 1) Default MB-scale tile selection (single tile / single split here).
    out = readout_layer(x, att_w, att_b, emb_w, emb_b, mlp_w, mlp_b)
    jax.block_until_ready(out)
    assert out.shape == (output_dim,)
    assert jnp.allclose(out, ref_f32, atol=1e-4, rtol=1e-4), (out, ref_f32)

    # 2) tile_n=8 -> 3 tiles (odd -> single split): exercises the accumulator
    #    loop and the last-tile-only masking branch.
    out2 = readout_layer(x, att_w, att_b, emb_w, emb_b, mlp_w, mlp_b, tile_n=8)
    jax.block_until_ready(out2)
    assert jnp.allclose(out2, ref_f32, atol=1e-4, rtol=1e-4), (out2, ref_f32)

    # 3) tile_n=16 -> 2 tiles -> 2 parallel splits (megacore path) with a
    #    partial (4-row) last tile.
    out3 = readout_layer(x, att_w, att_b, emb_w, emb_b, mlp_w, mlp_b, tile_n=16)
    jax.block_until_ready(out3)
    assert jnp.allclose(out3, ref_f32, atol=1e-4, rtol=1e-4), (out3, ref_f32)

    # 4) Optional bf16-matmul path (explicit opt-in; in-kernel cast, f32 acc).
    out4 = readout_layer(x, att_w, att_b, emb_w, emb_b, mlp_w, mlp_b,
                         tile_n=8, matmul_dtype=jnp.bfloat16)
    jax.block_until_ready(out4)
    ref_bf16 = _reference(x, att_w, att_b, emb_w, emb_b, mlp_w, mlp_b,
                          matmul_dtype=jnp.bfloat16)
    assert jnp.allclose(out4, ref_bf16, atol=2e-3, rtol=2e-3), (out4, ref_bf16)
    assert jnp.allclose(out4, ref_f32, atol=1e-1, rtol=1e-1), (out4, ref_f32)

    print("KERNEL_OK")
</pallas_src>

<mosaic_0001>
module attributes {stable_mosaic.version = 11 : i64} {
  func.func @_readout_kernel(%arg0: i32, %arg1: i32, %arg2: memref<24x32xf32, #tpu.memory_space<vmem>>, %arg3: memref<32x33xf32, #tpu.memory_space<vmem>>, %arg4: memref<1x33xf32, #tpu.memory_space<vmem>>, %arg5: memref<1x1x32xf32, #tpu.memory_space<vmem>>, %arg6: memref<1x1x32xf32, #tpu.memory_space<vmem>>, %arg7: memref<1x32xf32, #tpu.memory_space<vmem>>, %arg8: memref<1x32xf32, #tpu.memory_space<vmem>>) attributes {dimension_semantics = [#tpu.dimension_semantics<parallel>, #tpu.dimension_semantics<arbitrary>], iteration_bounds = array<i64: 1, 1>, scalar_prefetch = 0 : i64, scratch_operands = 2 : i64, tpu.core_type = #tpu.core_type<tc>, window_params = [{transform_indices = @transform_0, window_bounds = array<i64: 24, 32>}, {pipeline_mode = #tpu.pipeline_mode<synchronous>, transform_indices = @transform_1, window_bounds = array<i64: 32, 33>}, {pipeline_mode = #tpu.pipeline_mode<synchronous>, transform_indices = @transform_2, window_bounds = array<i64: 1, 33>}, {transform_indices = @transform_3, window_bounds = array<i64: 1, 1, 32>}, {transform_indices = @transform_4, window_bounds = array<i64: 1, 1, 32>}]} {
    %c1_i32 = arith.constant 1 : i32
    %0 = arith.muli %arg0, %c1_i32 : i32
    %1 = arith.addi %0, %arg1 : i32
    %c0_i32 = arith.constant 0 : i32
    %2 = arith.cmpi eq, %arg1, %c0_i32 : i32
    %3 = arith.extui %2 : i1 to i32
    %c0_i32_0 = arith.constant 0 : i32
    %4 = arith.cmpi ne, %3, %c0_i32_0 : i32
    scf.if %4 {
      %cst_14 = arith.constant 0.000000e+00 : f32
      %31 = vector.broadcast %cst_14 : f32 to vector<1x32xf32>
      %c0_15 = arith.constant 0 : index
      %c0_16 = arith.constant 0 : index
      %32 = vector.load %arg7[%c0_15, %c0_16] : memref<1x32xf32, #tpu.memory_space<vmem>>, vector<1x32xf32>
      tpu.vector_store %arg7[%c0_15, %c0_16], %31 {strides = array<i32>} : memref<1x32xf32, #tpu.memory_space<vmem>>, vector<1x32xf32>,
      %cst_17 = arith.constant 0.000000e+00 : f32
      %33 = vector.broadcast %cst_17 : f32 to vector<1x32xf32>
      %c0_18 = arith.constant 0 : index
      %c0_19 = arith.constant 0 : index
      %34 = vector.load %arg8[%c0_18, %c0_19] : memref<1x32xf32, #tpu.memory_space<vmem>>, vector<1x32xf32>
      tpu.vector_store %arg8[%c0_18, %c0_19], %33 {strides = array<i32>} : memref<1x32xf32, #tpu.memory_space<vmem>>, vector<1x32xf32>,
    } else {
    }
    %c0 = arith.constant 0 : index
    %c0_1 = arith.constant 0 : index
    %5 = vector.load %arg2[%c0, %c0_1] : memref<24x32xf32, #tpu.memory_space<vmem>>, vector<24x32xf32>
    %c0_2 = arith.constant 0 : index
    %c0_3 = arith.constant 0 : index
    %6 = vector.load %arg3[%c0_2, %c0_3] : memref<32x33xf32, #tpu.memory_space<vmem>>, vector<32x33xf32>
    %cst = arith.constant dense<0.000000e+00> : vector<24x33xf32>
    %7 = tpu.matmul %5, %6, %cst {dimension_numbers = #tpu.dot_dimension_numbers<[1], [0], [0], [1], [0, 0, 1, 1], [], []>} : vector<24x32xf32>, vector<32x33xf32>, vector<24x33xf32> -> vector<24x33xf32>
    %c0_4 = arith.constant 0 : index
    %c0_5 = arith.constant 0 : index
    %8 = vector.load %arg4[%c0_4, %c0_5] : memref<1x33xf32, #tpu.memory_space<vmem>>, vector<1x33xf32>
    %9 = vector.broadcast %8 : vector<1x33xf32> to vector<24x33xf32>
    %10 = arith.addf %7, %9 : vector<24x33xf32>
    %11 = vector.extract_strided_slice %10 {offsets = [0, 0], sizes = [24, 32], strides = [1, 1]} : vector<24x33xf32> to vector<24x32xf32>
    %cst_6 = arith.constant 0.000000e+00 : f32
    %12 = vector.broadcast %cst_6 : f32 to vector<24x32xf32>
    %13 = arith.maximumf %11, %12 : vector<24x32xf32>
    %14 = vector.extract_strided_slice %10 {offsets = [0, 32], sizes = [24, 1], strides = [1, 1]} : vector<24x33xf32> to vector<24x1xf32>
    %15 = arith.negf %14 : vector<24x1xf32>
    %16 = math.exp %15 : vector<24x1xf32>
    %cst_7 = arith.constant 1.000000e+00 : f32
    %17 = vector.broadcast %cst_7 : f32 to vector<24x1xf32>
    %18 = arith.addf %17, %16 : vector<24x1xf32>
    %19 = arith.divf %17, %18 : vector<24x1xf32>
    %20 = vector.broadcast %19 : vector<24x1xf32> to vector<24x32xf32>
    %21 = arith.mulf %20, %13 : vector<24x32xf32>
    %c0_i32_8 = arith.constant 0 : i32
    %22 = arith.cmpi eq, %1, %c0_i32_8 : i32
    %23 = arith.extui %22 : i1 to i32
    %c0_i32_9 = arith.constant 0 : i32
    %24 = arith.cmpi ne, %23, %c0_i32_9 : i32
    scf.if %24 {
      %c24_i32 = arith.constant 24 : i32
      %31 = arith.muli %1, %c24_i32 : i32
      %32 = tpu.iota {dimensions = array<i32: 0>} : vector<24x1xi32>
      %33 = vector.broadcast %31 : i32 to vector<24x1xi32>
      %34 = arith.addi %33, %32 : vector<24x1xi32>
      %c20_i32 = arith.constant 20 : i32
      %35 = vector.broadcast %c20_i32 : i32 to vector<24x1xi32>
      %36 = arith.cmpi slt, %34, %35 : vector<24x1xi32>
      %cst_14 = arith.constant 0.000000e+00 : f32
      %37 = vector.shape_cast %36 : vector<24x1xi1> to vector<24x1xi1>
      %38 = vector.broadcast %37 : vector<24x1xi1> to vector<24x32xi1>
      %39 = vector.broadcast %cst_14 : f32 to vector<24x32xf32>
      %40 = arith.select %38, %21, %39 : vector<24x32xi1>, vector<24x32xf32>
      %c0_15 = arith.constant 0 : index
      %c0_16 = arith.constant 0 : index
      %41 = vector.load %arg7[%c0_15, %c0_16] : memref<1x32xf32, #tpu.memory_space<vmem>>, vector<1x32xf32>
      %cst_17 = arith.constant dense<0.000000e+00> : vector<32xf32>
      %42 = vector.multi_reduction <add>, %40, %cst_17 [0] : vector<24x32xf32> to vector<32xf32>
      %43 = vector.shape_cast %42 : vector<32xf32> to vector<1x32xf32>
      %44 = arith.addf %41, %43 : vector<1x32xf32>
      %c0_18 = arith.constant 0 : index
      %c0_19 = arith.constant 0 : index
      %45 = vector.load %arg7[%c0_18, %c0_19] : memref<1x32xf32, #tpu.memory_space<vmem>>, vector<1x32xf32>
      tpu.vector_store %arg7[%c0_18, %c0_19], %44 {strides = array<i32>} : memref<1x32xf32, #tpu.memory_space<vmem>>, vector<1x32xf32>,
      %c0_20 = arith.constant 0 : index
      %c0_21 = arith.constant 0 : index
      %46 = vector.load %arg8[%c0_20, %c0_21] : memref<1x32xf32, #tpu.memory_space<vmem>>, vector<1x32xf32>
      %cst_22 = arith.constant dense<0xFF800000> : vector<32xf32>
      %47 = vector.multi_reduction <maximumf>, %40, %cst_22 [0] : vector<24x32xf32> to vector<32xf32>
      %48 = vector.shape_cast %47 : vector<32xf32> to vector<1x32xf32>
      %49 = arith.maximumf %46, %48 : vector<1x32xf32>
      %c0_23 = arith.constant 0 : index
      %c0_24 = arith.constant 0 : index
      %50 = vector.load %arg8[%c0_23, %c0_24] : memref<1x32xf32, #tpu.memory_space<vmem>>, vector<1x32xf32>
      tpu.vector_store %arg8[%c0_23, %c0_24], %49 {strides = array<i32>} : memref<1x32xf32, #tpu.memory_space<vmem>>, vector<1x32xf32>,
    } else {
    }
    %c0_i32_10 = arith.constant 0 : i32
    %25 = arith.cmpi ne, %1, %c0_i32_10 : i32
    %26 = arith.extui %25 : i1 to i32
    %c0_i32_11 = arith.constant 0 : i32
    %27 = arith.cmpi ne, %26, %c0_i32_11 : i32
    scf.if %27 {
      %c0_14 = arith.constant 0 : index
      %c0_15 = arith.constant 0 : index
      %31 = vector.load %arg7[%c0_14, %c0_15] : memref<1x32xf32, #tpu.memory_space<vmem>>, vector<1x32xf32>
      %cst_16 = arith.constant dense<0.000000e+00> : vector<32xf32>
      %32 = vector.multi_reduction <add>, %21, %cst_16 [0] : vector<24x32xf32> to vector<32xf32>
      %33 = vector.shape_cast %32 : vector<32xf32> to vector<1x32xf32>
      %34 = arith.addf %31, %33 : vector<1x32xf32>
      %c0_17 = arith.constant 0 : index
      %c0_18 = arith.constant 0 : index
      %35 = vector.load %arg7[%c0_17, %c0_18] : memref<1x32xf32, #tpu.memory_space<vmem>>, vector<1x32xf32>
      tpu.vector_store %arg7[%c0_17, %c0_18], %34 {strides = array<i32>} : memref<1x32xf32, #tpu.memory_space<vmem>>, vector<1x32xf32>,
      %c0_19 = arith.constant 0 : index
      %c0_20 = arith.constant 0 : index
      %36 = vector.load %arg8[%c0_19, %c0_20] : memref<1x32xf32, #tpu.memory_space<vmem>>, vector<1x32xf32>
      %cst_21 = arith.constant dense<0xFF800000> : vector<32xf32>
      %37 = vector.multi_reduction <maximumf>, %21, %cst_21 [0] : vector<24x32xf32> to vector<32xf32>
      %38 = vector.shape_cast %37 : vector<32xf32> to vector<1x32xf32>
      %39 = arith.maximumf %36, %38 : vector<1x32xf32>
      %c0_22 = arith.constant 0 : index
      %c0_23 = arith.constant 0 : index
      %40 = vector.load %arg8[%c0_22, %c0_23] : memref<1x32xf32, #tpu.memory_space<vmem>>, vector<1x32xf32>
      tpu.vector_store %arg8[%c0_22, %c0_23], %39 {strides = array<i32>} : memref<1x32xf32, #tpu.memory_space<vmem>>, vector<1x32xf32>,
    } else {
    }
    %c0_i32_12 = arith.constant 0 : i32
    %28 = arith.cmpi eq, %arg1, %c0_i32_12 : i32
    %29 = arith.extui %28 : i1 to i32
    %c0_i32_13 = arith.constant 0 : i32
    %30 = arith.cmpi ne, %29, %c0_i32_13 : i32
    scf.if %30 {
      %c0_14 = arith.constant 0 : index
      %c0_15 = arith.constant 0 : index
      %31 = vector.load %arg7[%c0_14, %c0_15] : memref<1x32xf32, #tpu.memory_space<vmem>>, vector<1x32xf32>
      %32 = vector.shape_cast %31 : vector<1x32xf32> to vector<1x1x32xf32>
      %c0_16 = arith.constant 0 : index
      %c0_17 = arith.constant 0 : index
      %c0_18 = arith.constant 0 : index
      %33 = vector.load %arg5[%c0_16, %c0_17, %c0_18] : memref<1x1x32xf32, #tpu.memory_space<vmem>>, vector<1x1x32xf32>
      tpu.vector_store %arg5[%c0_16, %c0_17, %c0_18], %32 {strides = array<i32>} : memref<1x1x32xf32, #tpu.memory_space<vmem>>, vector<1x1x32xf32>,
      %c0_19 = arith.constant 0 : index
      %c0_20 = arith.constant 0 : index
      %34 = vector.load %arg8[%c0_19, %c0_20] : memref<1x32xf32, #tpu.memory_space<vmem>>, vector<1x32xf32>
      %35 = vector.shape_cast %34 : vector<1x32xf32> to vector<1x1x32xf32>
      %c0_21 = arith.constant 0 : index
      %c0_22 = arith.constant 0 : index
      %c0_23 = arith.constant 0 : index
      %36 = vector.load %arg6[%c0_21, %c0_22, %c0_23] : memref<1x1x32xf32, #tpu.memory_space<vmem>>, vector<1x1x32xf32>
      tpu.vector_store %arg6[%c0_21, %c0_22, %c0_23], %35 {strides = array<i32>} : memref<1x1x32xf32, #tpu.memory_space<vmem>>, vector<1x1x32xf32>,
    } else {
    }
    return
  }
  func.func @transform_0(%arg0: i32, %arg1: i32) -> (i32, i32) {
    %c1_i32 = arith.constant 1 : i32
    %0 = arith.muli %arg0, %c1_i32 : i32
    %1 = arith.addi %0, %arg1 : i32
    %c0_i32 = arith.constant 0 : i32
    %c0_i32_0 = arith.constant 0 : i32
    return %1, %c0_i32 : i32, i32
  }
  func.func @transform_1(%arg0: i32, %arg1: i32) -> (i32, i32) {
    %c0_i32 = arith.constant 0 : i32
    %c0_i32_0 = arith.constant 0 : i32
    %c0_i32_1 = arith.constant 0 : i32
    return %c0_i32, %c0_i32_0 : i32, i32
  }
  func.func @transform_2(%arg0: i32, %arg1: i32) -> (i32, i32) {
    %c0_i32 = arith.constant 0 : i32
    %c0_i32_0 = arith.constant 0 : i32
    %c0_i32_1 = arith.constant 0 : i32
    return %c0_i32, %c0_i32_0 : i32, i32
  }
  func.func @transform_3(%arg0: i32, %arg1: i32) -> (i32, i32, i32) {
    %c0_i32 = arith.constant 0 : i32
    %c0_i32_0 = arith.constant 0 : i32
    %c0_i32_1 = arith.constant 0 : i32
    return %arg0, %c0_i32, %c0_i32_0 : i32, i32, i32
  }
  func.func @transform_4(%arg0: i32, %arg1: i32) -> (i32, i32, i32) {
    %c0_i32 = arith.constant 0 : i32
    %c0_i32_0 = arith.constant 0 : i32
    %c0_i32_1 = arith.constant 0 : i32
    return %arg0, %c0_i32, %c0_i32_0 : i32, i32, i32
  }
}

</mosaic_0001>

<bundles_post_ra>
// kernel: tpu_custom_call.1
= control target key start
LH: loop header
LB: loop body
LE: loop exit
PB: predicated region body
PF: predicated region fallthrough
CT: control target
= control target key end

     0   :  { %10 = vsyncpa [#allocation5], 0  ;;  %s558_s0 = inlined_call_operand.hbm [shape: f32[20,32], index: 0, kind: input, shape index: {}]   ;;  %s559_s1 = inlined_call_operand.hbm [shape: f32[32,33], index: 1, kind: input, shape index: {}]   ;;  %s560_s2 = inlined_call_operand.vmem [shape: f32[1,33], index: 2, kind: input, shape index: {}]   ;;  %s561_s3 = inlined_call_operand.hbm [shape: f32[1,1,32], index: 3, kind: output, shape index: {0}]   ;;  %s562_s4 = inlined_call_operand.hbm [shape: f32[1,1,32], index: 4, kind: output, shape index: {1}]  }
   0x1   :  { %11 = vsyncpa [#allocation8], 0 }
   0x2   :  { %12 = vsyncpa [#allocation6], 0 }
   0x3   :  { %13 = vsyncpa [#allocation11], 0  ;;  %s478_s15 = smov [#allocation4]  }
   0x4   :  { %s23_s16 = sshll.u32 %s478_s15, 4  ;;  %s24_s16 = int_to_ptr.vmem [resolvable:$true] %s23_s16 }
   0x5   :  { %s398_s17 = scalar_lea.vmem %s24_s16, 384  ;;  %p403_p1 = scmp.lt.s32.totalorder %s24_s16, %s24_s16 }
   0x6   :  { %p399_p0 = scmp.ne.s32.totalorder %s24_s16, %s398_s17  ;;  %p404_p2 = scmp.lt.s32.totalorder %s398_s17, %s398_s17 }
   0x8   :  { %p405_p3 = por %p404_p2, %p403_p1 }
   0xa   :  { %p406_p4 = pnand %p405_p3, %p399_p0 }
   0xc   :  { %409 = shalt.err (!%p406_p4)
}
   0xd   :  { %s479_s18 = smov 128   ;;  %s480_s19 = smov 8  }
   0xe   :  { %29 = dma.hbm_to_vmem [thread:$0]  %s558_s0, 384, %s24_s16, [#allocation5], %s479_s18, %s479_s18, %s480_s19  }
   0xf   :  { %s481_s22 = smov [#allocation7]  }
  0x10   :  { %s35_s23 = sshll.u32 %s481_s22, 4  ;;  %s36_s23 = int_to_ptr.vmem [resolvable:$true] %s35_s23 }
  0x11   :  { %s418_s24 = scalar_lea.vmem %s36_s23, 512  ;;  %p423_p6 = scmp.lt.s32.totalorder %s36_s23, %s36_s23 }
  0x12   :  { %p419_p5 = scmp.ne.s32.totalorder %s36_s23, %s418_s24  ;;  %p424_p7 = scmp.lt.s32.totalorder %s418_s24, %s418_s24 }
  0x14   :  { %p425_p8 = por %p424_p7, %p423_p6 }
  0x16   :  { %p426_p9 = pnand %p425_p8, %p419_p5 }
  0x18   :  { %429 = shalt.err (!%p426_p9)
}
  0x19   :  { %41 = dma.hbm_to_vmem [thread:$0]  %s559_s1, 512, %s36_s23, [#allocation8], %s479_s18, %s479_s18, %s480_s19  }
  0x1a   :  { %470 = dma.done.wait [#allocation5], 384  }
  0x1b   :  { %471 = vsyncadd [#allocation5], 4294966912 }
  0x1c   :  { %472 = dma.done.wait [#allocation8], 512  }
  0x1d   :  { %473 = vsyncadd [#allocation8], 4294966784  ;;  %v482_v0 = vmov 0.0   ;;  %vm483_vm0 = vmmov 0   ;;  %v66_v1 = vld [vmem:[#allocation7 + $0x18] sm:$0xff]  ;;  %v65_v2 = vld [vmem:[#allocation7 + $0x10] sm:$0xff]  ;;  %v208_v31 = vlaneseq }
  0x1e   :  { %342 = vmatprep.subr.mxu0 %v482_v0  ;;  %359 = vmatprep.subr.mxu1 %v482_v0  ;;  %v64_v3 = vld [vmem:[#allocation7 + $0x8] sm:$0xff]  ;;  %v63_v4 = vld [vmem:[#allocation7] sm:$0xff]  ;;  %vm74_vm1 = vcmask 261120   ;;  %v61_v6 = vld [vmem:[#allocation4 + $0x8] sm:$0xff]  ;;  %v484_v8 = vmov 32   ;;  %vm57_vm2 = vcmask 253952  }
  0x1f   :  { %350 = vmatprep.mubr.msk.f32.mxu0 %vm483_vm0, %v482_v0  ;;  %353 = vmatprep.mubr.msk.f32.mxu1 %vm483_vm0, %v482_v0  ;;  %v60_v5 = vld [vmem:[#allocation4] sm:$0xff]  ;;  %v62_v7 = vld [vmem:[#allocation4 + $0x10] sm:$0xff]  ;;  %v328_v9 = vld [vmem:[%s560_s2] ss:$0 sm:$0xff]  ;;  %58 = vst.msk [vmem:[#allocation2] sm:$0x1] %vm57_vm2, %v482_v0 }
  0x20   :  { %343 = vmatpush3.msra.mxu0 %v66_v1  ;;  %363 = vmatpush3.msra.mxu1 %v66_v1  ;;  %59 = vst.msk [vmem:[#allocation3] sm:$0x1] %vm57_vm2, %v482_v0  ;;  %v209_v32 = vshrl.u32 %v208_v31, 7  ;;  %s485_s2 = smov [#allocation9]   ;;  %s486_s28 = smov [#allocation10]  }
  0x21   :  { %344 = vmatprep.subr.mxu0 %v482_v0  ;;  %360 = vmatprep.subr.mxu1 %v482_v0  ;;  %s304_s27 = sshll.u32 %s485_s2, 4  ;;  %s314_s29 = sshll.u32 %s486_s28, 4  ;;  %s305_s27 = int_to_ptr.vmem [resolvable:$true] %s304_s27  ;;  %s315_s29 = int_to_ptr.vmem [resolvable:$true] %s314_s29 }
  0x22   :  { %345 = vmatpush3.msra.mxu0 %v65_v2  ;;  %364 = vmatpush3.msra.mxu1 %v65_v2  ;;  %v211_v35 = vadd.s32 16, %v209_v32  ;;  %s430_s30 = scalar_lea.vmem %s305_s27, 16  ;;  %s434_s5 = scalar_lea.vmem %s305_s27, 32 }
  0x23   :  { %346 = vmatprep.subr.mxu0 %v482_v0  ;;  %361 = vmatprep.subr.mxu1 %v482_v0  ;;  %p431_p10 = scmp.ne.s32.totalorder %s305_s27, %s430_s30  ;;  %p435_p11 = scmp.lt.s32.totalorder %s305_s27, %s305_s27 }
  0x24   :  { %347 = vmatpush3.msra.mxu0 %v64_v3  ;;  %365 = vmatpush3.msra.mxu1 %v64_v3  ;;  %vm218_vm3 = vcmp.lt.s32.totalorder %v211_v35, 20  ;;  %p436_p12 = scmp.lt.s32.totalorder %s434_s5, %s430_s30 }
  0x25   :  { %348 = vmatprep.subr.mxu0 %v482_v0  ;;  %362 = vmatprep.subr.mxu1 %v482_v0 }
  0x26   :  { %349 = vmatpush3.msra.mxu0 %v63_v4  ;;  %366 = vmatpush3.msra.mxu1 %v63_v4  ;;  %p437_p13 = por %p436_p12, %p435_p11 }
  0x27   :  { %351 = vmatmul.mubr.msk.f32.vlgmr.msra.gmra.mxu0 %vm74_vm1, %v60_v5  ;;  %354 = vmatmul.mubr.msk.f32.vlgmr.msra.gmra.mxu1 %vm74_vm1, %v61_v6  ;;  %v243_v1 = vld [vmem:[#allocation3] sm:$0x1] }
  0x28   :  { %356 = vmatprep.mubr.msk.f32.mxu1 %vm483_vm0, %v482_v0  ;;  %376 = vset.pattern.permute.xlu0 %v484_v8  ;;  %v228_v0 = vld [vmem:[#allocation2] sm:$0x1]  ;;  %p438_p0 = pnand %p437_p13, %p431_p10 }
  0x29   :  { %377 = vset.pattern.permute.xlu1 %v484_v8 }
  0x2b   :  { %357 = vmatmul.mubr.msk.f32.gmra.mxu1 %vm74_vm1, %v62_v7 }
  0xe7   :  { %v150_v10 = vpop.f32.mrf.mxu0  ;;  %v155_v11 = vpop.f32.mrf.mxu1 }
  0xe8   :  { %v151_v12 = vadd.f32 %v328_v9, %v150_v10  ;;  %v156_v13 = vadd.f32 %v328_v9, %v155_v11 }
  0xe9   :  { %v352_v14 = vpop.f32.mrf.mxu0  ;;  %v355_v15 = vpop.f32.mrf.mxu1 }
  0xea   :  { %v332_v16 = vmul.f32 -1.442695, %v151_v12  ;;  %v333_v17 = vmul.f32 -1.442695, %v156_v13  ;;  %v164_v34 = vmax.f32 %v151_v12, 0.0  ;;  %v165_v38 = vmax.f32 %v156_v13, 0.0 }
  0xeb   :  { %v160_v18 = vpop.f32.mrf.mxu1 }
  0xec   :  { %378 = vpow2.f32 %v332_v16  ;;  %v161_v19 = vadd.f32 %v328_v9, %v160_v18 }
  0xed   :  { %380 = vpow2.f32 %v333_v17  ;;  %v358_v20 = vpop.f32.mrf.mxu1 }
  0xee   :  { %v334_v21 = vmul.f32 -1.442695, %v161_v19  ;;  %v166_v37 = vmax.f32 %v161_v19, 0.0 }
  0xf0   :  { %382 = vpow2.f32 %v334_v21 }
  0xf9   :  { %v379_v22 = vpop.eup %378 }
  0xfa   :  { %v381_v23 = vpop.eup %380  ;;  %v176_v24 = vadd.f32 1.0, %v379_v22 }
  0xfb   :  { %v177_v25 = vadd.f32 1.0, %v381_v23 }
  0xfc   :  { %384 = vrcp.f32 %v176_v24 }
  0xfd   :  { %v383_v26 = vpop.eup %382  ;;  %386 = vrcp.f32 %v177_v25 }
  0xfe   :  { %v178_v27 = vadd.f32 1.0, %v383_v26 }
 0x100   :  { %388 = vrcp.f32 %v178_v27 }
 0x109   :  { %v385_v28 = vpop.eup %384 }
 0x10a   :  { %187 = vperm.xlu0 %376, %v385_v28   ;;  %v387_v29 = vpop.eup %386 }
 0x10d   :  { %v389_v30 = vpop.eup %388 }
 0x10e   :  { %197 = vperm.xlu1 %377, %v389_v30   ;;  %192 = vperm.xlu0 %376, %v387_v29  }
 0x185   :  { %v188_v33 = vpop.permute.xlu0 %187 }
 0x186   :  { %v200_v36 = vmul.f32 %v188_v33, %v164_v34 }
 0x188   :  { %v229_v43 = vsel %vm74_vm1, %v200_v36, 0.0  ;;  %v244_v44 = vsel %vm74_vm1, %v200_v36, -inf }
 0x189   :  { %v198_v39 = vpop.permute.xlu1 %197  ;;  %v193_v40 = vpop.permute.xlu0 %192 }
 0x18a   :  { %v202_v41 = vmul.f32 %v198_v39, %v166_v37  ;;  %v201_v42 = vmul.f32 %v193_v40, %v165_v38 }
 0x18c   :  { %v227_v45 = vsel %vm218_vm3, %v202_v41, 0.0  ;;  %v230_v46 = vsel %vm74_vm1, %v201_v42, 0.0  ;;  %v245_v47 = vsel %vm74_vm1, %v201_v42, -inf }
 0x18d   :  { %v232_v48 = vsel %vm74_vm1, %v227_v45, 0.0  ;;  %v246_v49 = vsel %vm74_vm1, %v227_v45, -inf  ;;  %v231_v50 = vadd.f32 %v230_v46, %v229_v43  ;;  %v247_v51 = vmax.f32 %v244_v44, %v245_v47 }
 0x18f   :  { %v233_v52 = vadd.f32 %v232_v48, %v231_v50  ;;  %v248_v53 = vmax.f32 %v247_v51, %v246_v49 }
 0x191   :  { %v234_v54 = vrot.slane %v233_v52, 4  ;;  %v249_v55 = vrot.slane %v248_v53, 4 }
 0x193   :  { %v235_v56 = vadd.f32 %v234_v54, %v233_v52  ;;  %v250_v57 = vmax.f32 %v248_v53, %v249_v55 }
 0x195   :  { %v236_v58 = vrot.slane %v235_v56, 2  ;;  %v251_v59 = vrot.slane %v250_v57, 2 }
 0x197   :  { %v237_v60 = vadd.f32 %v236_v58, %v235_v56  ;;  %v252_v61 = vmax.f32 %v250_v57, %v251_v59 }
 0x199   :  { %v238_v62 = vrot.slane %v237_v60, 1  ;;  %v253_v63 = vrot.slane %v252_v61, 1 }
 0x19b   :  { %v239_v2 = vadd.f32 %v238_v62, %v237_v60  ;;  %v254_v3 = vmax.f32 %v252_v61, %v253_v63 }
 0x19d   :  { %v240_v4 = vadd.f32 %v239_v2, %v228_v0  ;;  %v255_v5 = vmax.f32 %v243_v1, %v254_v3 }
 0x19f   :  { %242 = vst.msk [vmem:[#allocation2] sm:$0x1] %vm57_vm2, %v240_v4  ;;  %256 = vst.msk [vmem:[#allocation3] sm:$0x1] %vm57_vm2, %v255_v5 }
 0x1a6   :  { %v293_v6 = vld [vmem:[#allocation2] sm:$0x1]  ;;  %v296_v7 = vld [vmem:[#allocation3] sm:$0x1] }
 0x1a7   :  { %295 = vst.msk [vmem:[#allocation9] sm:$0x1] %vm57_vm2, %v293_v6  ;;  %297 = vst.msk [vmem:[#allocation10] sm:$0x1] %vm57_vm2, %v296_v7 }
 0x1a8   :  { %441 = shalt.err (!%p438_p0)
}
 0x1a9   :  { %307 = dma.vmem_to_hbm [thread:$0]  %s305_s27, 16, %s561_s3, [#allocation6]  }
 0x1aa   :  { %s450_s8 = scalar_lea.vmem %s315_s29, 16  ;;  %s454_s9 = scalar_lea.vmem %s315_s29, 32 }
 0x1ab   :  { %p451_p1 = scmp.ne.s32.totalorder %s315_s29, %s450_s8  ;;  %p455_p2 = scmp.lt.s32.totalorder %s315_s29, %s315_s29 }
 0x1ac   :  { %p456_p3 = scmp.lt.s32.totalorder %s454_s9, %s450_s8 }
 0x1ae   :  { %p457_p4 = por %p456_p3, %p455_p2 }
 0x1b0   :  { %p458_p5 = pnand %p457_p4, %p451_p1 }
 0x1b2   :  { %461 = shalt.err (!%p458_p5)
}
 0x1b3   :  { %317 = dma.vmem_to_hbm [thread:$0]  %s315_s29, 16, %s562_s4, [#allocation11]  }
 0x1b4   :  { %474 = dma.done.wait [#allocation6], 16  }
 0x1b5   :  { %475 = vsyncadd [#allocation6], 4294967280 }
 0x1b6   :  { %476 = dma.done.wait [#allocation11], 16  }
 0x1b7   :  { %477 = vsyncadd [#allocation11], 4294967280 }
 0x1b8   :  { %324 = vsyncpa [#allocation5], 1 }
 0x1b9   :  { %325 = vsyncpa [#allocation8], 1 }
 0x1ba   :  { %326 = vsyncpa [#allocation6], 1 }
 0x1bb   :  { %327 = vsyncpa [#allocation11], 1 }

</bundles_post_ra>
